<compile_context>
chip_gen: v6e
topology: v6e:2x2x1
jax: 0.10.0
libtpu: 0.0.40
codegen_flags: <defaults>
</compile_context>

<pallas_src>
import jax
import jax.numpy as jnp
from jax import lax
from jax.experimental import pallas as pl
from jax.experimental.pallas import tpu as pltpu


def fnn_lm_kernel(words_ref, emb_ref, w1_ref, b1_ref, w2_ref, b2_ref,
                  w3_ref, b3_ref, out_ref):
    tb, num_hist = words_ref.shape
    nwords, emb_size = emb_ref.shape
    hid_size = w1_ref.shape[1]

    words = words_ref[...]                                  # (TB, num_hist) int32
    emb_tab = emb_ref[...]                                  # (nwords, E) bf16
    vocab_ids = lax.broadcasted_iota(jnp.int32, (tb, nwords), 1)

    # feat @ W1  ==  sum_h  onehot(words[:, h]) @ emb_table @ W1[h*E:(h+1)*E, :]
    acc1 = jnp.zeros((tb, hid_size), jnp.float32)
    for h in range(num_hist):                               # static unroll (num_hist small)
        onehot = (words[:, h:h + 1] == vocab_ids).astype(jnp.bfloat16)   # (TB, nwords)
        emb_h = jnp.dot(onehot, emb_tab,
                        preferred_element_type=jnp.float32)              # (TB, E) f32
        w1_h = w1_ref[h * emb_size:(h + 1) * emb_size, :]                # (E, H) bf16 (static slice)
        acc1 = acc1 + jnp.dot(emb_h.astype(jnp.bfloat16), w1_h,
                              preferred_element_type=jnp.float32)
    h1 = jnp.tanh(acc1 + b1_ref[...])                                    # (TB, H) f32

    h2 = jnp.tanh(
        jnp.dot(h1.astype(jnp.bfloat16), w2_ref[...],
                preferred_element_type=jnp.float32) + b2_ref[...])       # (TB, H) f32

    out_ref[...] = (
        jnp.dot(h2.astype(jnp.bfloat16), w3_ref[...],
                preferred_element_type=jnp.float32) + b3_ref[...])       # (TB, nwords) f32


def fnn_lm_forward(words, emb_table, w1, b1, w2, b2, w3, b3, *, block_b=8):
    """words: (B, num_hist) int32; returns logits (B, nwords) float32.

    Weights are stored pre-transposed as (in_features, out_features); biases as
    (1, out_features).  Matmul operands are cast to bf16 at the call boundary
    (halves weight DMA bytes, full-rate MXU); biases stay f32.
    """
    B, num_hist = words.shape
    nwords, emb_size = emb_table.shape
    assert w1.shape == (num_hist * emb_size, w1.shape[1])
    assert w3.shape[1] == nwords

    bf16 = jnp.bfloat16
    emb_bf = emb_table.astype(bf16)
    w1_bf = w1.astype(bf16)
    w2_bf = w2.astype(bf16)
    w3_bf = w3.astype(bf16)

    # Invariant operands: constant index map -> stay resident in VMEM across grid steps.
    def const2d(arr):
        return pl.BlockSpec(arr.shape, lambda i: (0, 0))

    grid = (pl.cdiv(B, block_b),)

    return pl.pallas_call(
        fnn_lm_kernel,
        out_shape=jax.ShapeDtypeStruct((B, nwords), jnp.float32),
        grid=grid,
        in_specs=[
            pl.BlockSpec((block_b, num_hist), lambda i: (i, 0)),   # words (int32), batch-tiled
            const2d(emb_bf),                                       # embedding table
            const2d(w1_bf), const2d(b1),
            const2d(w2_bf), const2d(b2),
            const2d(w3_bf), const2d(b3),
        ],
        out_specs=pl.BlockSpec((block_b, nwords), lambda i: (i, 0)),
        compiler_params=pltpu.CompilerParams(
            dimension_semantics=("parallel",),          # megacore sharding on v7x
            vmem_limit_bytes=32 * 1024 * 1024,          # safe on v7x (64 MiB phys) too
        ),
    )(words, emb_bf, w1_bf, b1, w2_bf, b2, w3_bf, b3)


def init_params(key, nwords, emb_size, hid_size, num_hist):
    """Deterministic parameter init mimicking the PyTorch module's shapes.

    The original Sequential uses Linear(emb_size, hid_size) as its second layer,
    which only type-checks when emb_size == hid_size; we follow that convention.
    """
    assert emb_size == hid_size, "original FNN_LM only works when emb_size == hid_size"
    k = jax.random.split(key, 7)

    def uniform(kk, shape, fan_in):
        bound = 1.0 / jnp.sqrt(float(fan_in))
        return jax.random.uniform(kk, shape, jnp.float32, -bound, bound)

    emb_table = jax.random.normal(k[0], (nwords, emb_size), jnp.float32)
    in1 = num_hist * emb_size
    w1 = uniform(k[1], (in1, hid_size), in1)            # (in, out) = W1.T
    b1 = uniform(k[2], (1, hid_size), in1)
    w2 = uniform(k[3], (emb_size, hid_size), emb_size)  # (in, out) = W2.T
    b2 = uniform(k[4], (1, hid_size), emb_size)
    w3 = uniform(k[5], (hid_size, nwords), hid_size)    # (in, out) = W3.T
    b3 = uniform(k[6], (1, nwords), hid_size)
    return emb_table, w1, b1, w2, b2, w3, b3


def reference_forward(words, emb_table, w1, b1, w2, b2, w3, b3):
    """Pure-JAX reference with the same bf16-operand / f32-accumulate numerics."""
    bf16 = jnp.bfloat16
    B = words.shape[0]
    feat = jnp.take(emb_table.astype(bf16), words, axis=0).reshape(B, -1)   # (B, num_hist*E) bf16
    h1 = jnp.tanh(jnp.dot(feat, w1.astype(bf16),
                          preferred_element_type=jnp.float32) + b1)
    h2 = jnp.tanh(jnp.dot(h1.astype(bf16), w2.astype(bf16),
                          preferred_element_type=jnp.float32) + b2)
    return jnp.dot(h2.astype(bf16), w3.astype(bf16),
                   preferred_element_type=jnp.float32) + b3


if __name__ == "__main__":
    # Small, module-consistent shapes (num_hist*E = 128 -> lane-aligned W1).
    nwords = 256
    emb_size = 32
    hid_size = 32        # must equal emb_size (see init_params note)
    num_hist = 4
    batch = 16           # tiled as 2 grid steps of 8 rows

    key = jax.random.PRNGKey(0)
    kp, kw = jax.random.split(key)
    params = init_params(kp, nwords, emb_size, hid_size, num_hist)
    words = jax.random.randint(kw, (batch, num_hist), 0, nwords, jnp.int32)

    logits = fnn_lm_forward(words, *params, block_b=8)
    logits = jax.block_until_ready(logits)

    ref = reference_forward(words, *params)
    assert logits.shape == (batch, nwords)
    assert jnp.allclose(logits, ref, atol=1e-4, rtol=1e-4), (
        "max abs err = %f" % float(jnp.max(jnp.abs(logits - ref))))

    print("KERNEL_OK")
</pallas_src>

<mosaic_0001>
module attributes {stable_mosaic.version = 11 : i64} {
  func.func @fnn_lm_kernel(%arg0: i32, %arg1: memref<8x4xi32, #tpu.memory_space<vmem>>, %arg2: memref<256x32xbf16, #tpu.memory_space<vmem>>, %arg3: memref<128x32xbf16, #tpu.memory_space<vmem>>, %arg4: memref<1x32xf32, #tpu.memory_space<vmem>>, %arg5: memref<32x32xbf16, #tpu.memory_space<vmem>>, %arg6: memref<1x32xf32, #tpu.memory_space<vmem>>, %arg7: memref<32x256xbf16, #tpu.memory_space<vmem>>, %arg8: memref<1x256xf32, #tpu.memory_space<vmem>>, %arg9: memref<8x256xf32, #tpu.memory_space<vmem>>) attributes {dimension_semantics = [#tpu.dimension_semantics<parallel>], iteration_bounds = array<i64: 2>, scalar_prefetch = 0 : i64, scratch_operands = 0 : i64, tpu.core_type = #tpu.core_type<tc>, window_params = [{transform_indices = @transform_0, window_bounds = array<i64: 8, 4>}, {pipeline_mode = #tpu.pipeline_mode<synchronous>, transform_indices = @transform_1, window_bounds = array<i64: 256, 32>}, {pipeline_mode = #tpu.pipeline_mode<synchronous>, transform_indices = @transform_2, window_bounds = array<i64: 128, 32>}, {pipeline_mode = #tpu.pipeline_mode<synchronous>, transform_indices = @transform_3, window_bounds = array<i64: 1, 32>}, {pipeline_mode = #tpu.pipeline_mode<synchronous>, transform_indices = @transform_4, window_bounds = array<i64: 32, 32>}, {pipeline_mode = #tpu.pipeline_mode<synchronous>, transform_indices = @transform_5, window_bounds = array<i64: 1, 32>}, {pipeline_mode = #tpu.pipeline_mode<synchronous>, transform_indices = @transform_6, window_bounds = array<i64: 32, 256>}, {pipeline_mode = #tpu.pipeline_mode<synchronous>, transform_indices = @transform_7, window_bounds = array<i64: 1, 256>}, {transform_indices = @transform_8, window_bounds = array<i64: 8, 256>}]} {
    %c0 = arith.constant 0 : index
    %c0_0 = arith.constant 0 : index
    %0 = vector.load %arg1[%c0, %c0_0] : memref<8x4xi32, #tpu.memory_space<vmem>>, vector<8x4xi32>
    %c0_1 = arith.constant 0 : index
    %c0_2 = arith.constant 0 : index
    %1 = vector.load %arg2[%c0_1, %c0_2] : memref<256x32xbf16, #tpu.memory_space<vmem>>, vector<256x32xbf16>
    %2 = tpu.iota {dimensions = array<i32: 1>} : vector<8x256xi32>
    %cst = arith.constant 0.000000e+00 : f32
    %3 = vector.broadcast %cst : f32 to vector<8x32xf32>
    %4 = vector.extract_strided_slice %0 {offsets = [0, 0], sizes = [8, 1], strides = [1, 1]} : vector<8x4xi32> to vector<8x1xi32>
    %5 = vector.broadcast %4 : vector<8x1xi32> to vector<8x256xi32>
    %6 = arith.cmpi eq, %5, %2 : vector<8x256xi32>
    %7 = arith.extui %6 : vector<8x256xi1> to vector<8x256xi32>
    %8 = arith.sitofp %7 : vector<8x256xi32> to vector<8x256xf32>
    %9 = arith.truncf %8 : vector<8x256xf32> to vector<8x256xbf16>
    %cst_3 = arith.constant dense<0.000000e+00> : vector<8x32xf32>
    %10 = tpu.matmul %9, %1, %cst_3 {dimension_numbers = #tpu.dot_dimension_numbers<[1], [0], [0], [1], [0, 0, 1, 1], [], []>} : vector<8x256xbf16>, vector<256x32xbf16>, vector<8x32xf32> -> vector<8x32xf32>
    %c0_4 = arith.constant 0 : index
    %c0_5 = arith.constant 0 : index
    %11 = vector.load %arg3[%c0_4, %c0_5] : memref<128x32xbf16, #tpu.memory_space<vmem>>, vector<32x32xbf16>
    %12 = arith.truncf %10 : vector<8x32xf32> to vector<8x32xbf16>
    %cst_6 = arith.constant dense<0.000000e+00> : vector<8x32xf32>
    %13 = tpu.matmul %12, %11, %cst_6 {dimension_numbers = #tpu.dot_dimension_numbers<[1], [0], [0], [1], [0, 0, 1, 1], [], []>} : vector<8x32xbf16>, vector<32x32xbf16>, vector<8x32xf32> -> vector<8x32xf32>
    %14 = arith.addf %3, %13 : vector<8x32xf32>
    %15 = vector.extract_strided_slice %0 {offsets = [0, 1], sizes = [8, 1], strides = [1, 1]} : vector<8x4xi32> to vector<8x1xi32>
    %16 = vector.broadcast %15 : vector<8x1xi32> to vector<8x256xi32>
    %17 = arith.cmpi eq, %16, %2 : vector<8x256xi32>
    %18 = arith.extui %17 : vector<8x256xi1> to vector<8x256xi32>
    %19 = arith.sitofp %18 : vector<8x256xi32> to vector<8x256xf32>
    %20 = arith.truncf %19 : vector<8x256xf32> to vector<8x256xbf16>
    %cst_7 = arith.constant dense<0.000000e+00> : vector<8x32xf32>
    %21 = tpu.matmul %20, %1, %cst_7 {dimension_numbers = #tpu.dot_dimension_numbers<[1], [0], [0], [1], [0, 0, 1, 1], [], []>} : vector<8x256xbf16>, vector<256x32xbf16>, vector<8x32xf32> -> vector<8x32xf32>
    %c32 = arith.constant 32 : index
    %c0_8 = arith.constant 0 : index
    %22 = vector.load %arg3[%c32, %c0_8] : memref<128x32xbf16, #tpu.memory_space<vmem>>, vector<32x32xbf16>
    %23 = arith.truncf %21 : vector<8x32xf32> to vector<8x32xbf16>
    %cst_9 = arith.constant dense<0.000000e+00> : vector<8x32xf32>
    %24 = tpu.matmul %23, %22, %cst_9 {dimension_numbers = #tpu.dot_dimension_numbers<[1], [0], [0], [1], [0, 0, 1, 1], [], []>} : vector<8x32xbf16>, vector<32x32xbf16>, vector<8x32xf32> -> vector<8x32xf32>
    %25 = arith.addf %14, %24 : vector<8x32xf32>
    %26 = vector.extract_strided_slice %0 {offsets = [0, 2], sizes = [8, 1], strides = [1, 1]} : vector<8x4xi32> to vector<8x1xi32>
    %27 = vector.broadcast %26 : vector<8x1xi32> to vector<8x256xi32>
    %28 = arith.cmpi eq, %27, %2 : vector<8x256xi32>
    %29 = arith.extui %28 : vector<8x256xi1> to vector<8x256xi32>
    %30 = arith.sitofp %29 : vector<8x256xi32> to vector<8x256xf32>
    %31 = arith.truncf %30 : vector<8x256xf32> to vector<8x256xbf16>
    %cst_10 = arith.constant dense<0.000000e+00> : vector<8x32xf32>
    %32 = tpu.matmul %31, %1, %cst_10 {dimension_numbers = #tpu.dot_dimension_numbers<[1], [0], [0], [1], [0, 0, 1, 1], [], []>} : vector<8x256xbf16>, vector<256x32xbf16>, vector<8x32xf32> -> vector<8x32xf32>
    %c64 = arith.constant 64 : index
    %c0_11 = arith.constant 0 : index
    %33 = vector.load %arg3[%c64, %c0_11] : memref<128x32xbf16, #tpu.memory_space<vmem>>, vector<32x32xbf16>
    %34 = arith.truncf %32 : vector<8x32xf32> to vector<8x32xbf16>
    %cst_12 = arith.constant dense<0.000000e+00> : vector<8x32xf32>
    %35 = tpu.matmul %34, %33, %cst_12 {dimension_numbers = #tpu.dot_dimension_numbers<[1], [0], [0], [1], [0, 0, 1, 1], [], []>} : vector<8x32xbf16>, vector<32x32xbf16>, vector<8x32xf32> -> vector<8x32xf32>
    %36 = arith.addf %25, %35 : vector<8x32xf32>
    %37 = vector.extract_strided_slice %0 {offsets = [0, 3], sizes = [8, 1], strides = [1, 1]} : vector<8x4xi32> to vector<8x1xi32>
    %38 = vector.broadcast %37 : vector<8x1xi32> to vector<8x256xi32>
    %39 = arith.cmpi eq, %38, %2 : vector<8x256xi32>
    %40 = arith.extui %39 : vector<8x256xi1> to vector<8x256xi32>
    %41 = arith.sitofp %40 : vector<8x256xi32> to vector<8x256xf32>
    %42 = arith.truncf %41 : vector<8x256xf32> to vector<8x256xbf16>
    %cst_13 = arith.constant dense<0.000000e+00> : vector<8x32xf32>
    %43 = tpu.matmul %42, %1, %cst_13 {dimension_numbers = #tpu.dot_dimension_numbers<[1], [0], [0], [1], [0, 0, 1, 1], [], []>} : vector<8x256xbf16>, vector<256x32xbf16>, vector<8x32xf32> -> vector<8x32xf32>
    %c96 = arith.constant 96 : index
    %c0_14 = arith.constant 0 : index
    %44 = vector.load %arg3[%c96, %c0_14] : memref<128x32xbf16, #tpu.memory_space<vmem>>, vector<32x32xbf16>
    %45 = arith.truncf %43 : vector<8x32xf32> to vector<8x32xbf16>
    %cst_15 = arith.constant dense<0.000000e+00> : vector<8x32xf32>
    %46 = tpu.matmul %45, %44, %cst_15 {dimension_numbers = #tpu.dot_dimension_numbers<[1], [0], [0], [1], [0, 0, 1, 1], [], []>} : vector<8x32xbf16>, vector<32x32xbf16>, vector<8x32xf32> -> vector<8x32xf32>
    %47 = arith.addf %36, %46 : vector<8x32xf32>
    %c0_16 = arith.constant 0 : index
    %c0_17 = arith.constant 0 : index
    %48 = vector.load %arg4[%c0_16, %c0_17] : memref<1x32xf32, #tpu.memory_space<vmem>>, vector<1x32xf32>
    %49 = vector.broadcast %48 : vector<1x32xf32> to vector<8x32xf32>
    %50 = arith.addf %47, %49 : vector<8x32xf32>
    %51 = math.tanh %50 : vector<8x32xf32>
    %52 = arith.truncf %51 : vector<8x32xf32> to vector<8x32xbf16>
    %c0_18 = arith.constant 0 : index
    %c0_19 = arith.constant 0 : index
    %53 = vector.load %arg5[%c0_18, %c0_19] : memref<32x32xbf16, #tpu.memory_space<vmem>>, vector<32x32xbf16>
    %cst_20 = arith.constant dense<0.000000e+00> : vector<8x32xf32>
    %54 = tpu.matmul %52, %53, %cst_20 {dimension_numbers = #tpu.dot_dimension_numbers<[1], [0], [0], [1], [0, 0, 1, 1], [], []>} : vector<8x32xbf16>, vector<32x32xbf16>, vector<8x32xf32> -> vector<8x32xf32>
    %c0_21 = arith.constant 0 : index
    %c0_22 = arith.constant 0 : index
    %55 = vector.load %arg6[%c0_21, %c0_22] : memref<1x32xf32, #tpu.memory_space<vmem>>, vector<1x32xf32>
    %56 = vector.broadcast %55 : vector<1x32xf32> to vector<8x32xf32>
    %57 = arith.addf %54, %56 : vector<8x32xf32>
    %58 = math.tanh %57 : vector<8x32xf32>
    %59 = arith.truncf %58 : vector<8x32xf32> to vector<8x32xbf16>
    %c0_23 = arith.constant 0 : index
    %c0_24 = arith.constant 0 : index
    %60 = vector.load %arg7[%c0_23, %c0_24] : memref<32x256xbf16, #tpu.memory_space<vmem>>, vector<32x256xbf16>
    %cst_25 = arith.constant dense<0.000000e+00> : vector<8x256xf32>
    %61 = tpu.matmul %59, %60, %cst_25 {dimension_numbers = #tpu.dot_dimension_numbers<[1], [0], [0], [1], [0, 0, 1, 1], [], []>} : vector<8x32xbf16>, vector<32x256xbf16>, vector<8x256xf32> -> vector<8x256xf32>
    %c0_26 = arith.constant 0 : index
    %c0_27 = arith.constant 0 : index
    %62 = vector.load %arg8[%c0_26, %c0_27] : memref<1x256xf32, #tpu.memory_space<vmem>>, vector<1x256xf32>
    %63 = vector.broadcast %62 : vector<1x256xf32> to vector<8x256xf32>
    %64 = arith.addf %61, %63 : vector<8x256xf32>
    %c0_28 = arith.constant 0 : index
    %c0_29 = arith.constant 0 : index
    %65 = vector.load %arg9[%c0_28, %c0_29] : memref<8x256xf32, #tpu.memory_space<vmem>>, vector<8x256xf32>
    tpu.vector_store %arg9[%c0_28, %c0_29], %64 {strides = array<i32>} : memref<8x256xf32, #tpu.memory_space<vmem>>, vector<8x256xf32>,
    return
  }
  func.func @transform_0(%arg0: i32) -> (i32, i32) {
    %c0_i32 = arith.constant 0 : i32
    %c0_i32_0 = arith.constant 0 : i32
    return %arg0, %c0_i32 : i32, i32
  }
  func.func @transform_1(%arg0: i32) -> (i32, i32) {
    %c0_i32 = arith.constant 0 : i32
    %c0_i32_0 = arith.constant 0 : i32
    %c0_i32_1 = arith.constant 0 : i32
    return %c0_i32, %c0_i32_0 : i32, i32
  }
  func.func @transform_2(%arg0: i32) -> (i32, i32) {
    %c0_i32 = arith.constant 0 : i32
    %c0_i32_0 = arith.constant 0 : i32
    %c0_i32_1 = arith.constant 0 : i32
    return %c0_i32, %c0_i32_0 : i32, i32
  }
  func.func @transform_3(%arg0: i32) -> (i32, i32) {
    %c0_i32 = arith.constant 0 : i32
    %c0_i32_0 = arith.constant 0 : i32
    %c0_i32_1 = arith.constant 0 : i32
    return %c0_i32, %c0_i32_0 : i32, i32
  }
  func.func @transform_4(%arg0: i32) -> (i32, i32) {
    %c0_i32 = arith.constant 0 : i32
    %c0_i32_0 = arith.constant 0 : i32
    %c0_i32_1 = arith.constant 0 : i32
    return %c0_i32, %c0_i32_0 : i32, i32
  }
  func.func @transform_5(%arg0: i32) -> (i32, i32) {
    %c0_i32 = arith.constant 0 : i32
    %c0_i32_0 = arith.constant 0 : i32
    %c0_i32_1 = arith.constant 0 : i32
    return %c0_i32, %c0_i32_0 : i32, i32
  }
  func.func @transform_6(%arg0: i32) -> (i32, i32) {
    %c0_i32 = arith.constant 0 : i32
    %c0_i32_0 = arith.constant 0 : i32
    %c0_i32_1 = arith.constant 0 : i32
    return %c0_i32, %c0_i32_0 : i32, i32
  }
  func.func @transform_7(%arg0: i32) -> (i32, i32) {
    %c0_i32 = arith.constant 0 : i32
    %c0_i32_0 = arith.constant 0 : i32
    %c0_i32_1 = arith.constant 0 : i32
    return %c0_i32, %c0_i32_0 : i32, i32
  }
  func.func @transform_8(%arg0: i32) -> (i32, i32) {
    %c0_i32 = arith.constant 0 : i32
    %c0_i32_0 = arith.constant 0 : i32
    return %arg0, %c0_i32 : i32, i32
  }
}

</mosaic_0001>

<bundles_post_ra>
// kernel: tpu_custom_call.1
= control target key start
LH: loop header
LB: loop body
LE: loop exit
PB: predicated region body
PF: predicated region fallthrough
CT: control target
= control target key end

     0   :  { %13 = vsyncpa [#allocation3], 0  ;;  %s1885_s0 = inlined_call_operand.vmem [shape: s32[16,4], index: 0, kind: input, shape index: {}]   ;;  %s1886_s1 = inlined_call_operand.vmem [shape: bf16[256,32], index: 1, kind: input, shape index: {}]   ;;  %s1887_s2 = inlined_call_operand.vmem [shape: bf16[128,32], index: 2, kind: input, shape index: {}]   ;;  %s1888_s3 = inlined_call_operand.vmem [shape: f32[1,32], index: 3, kind: input, shape index: {}]   ;;  %s1889_s4 = inlined_call_operand.vmem [shape: bf16[32,32], index: 4, kind: input, shape index: {}]   ;;  %s1890_s5 = inlined_call_operand.vmem [shape: f32[1,32], index: 5, kind: input, shape index: {}]   ;;  %s1891_s6 = inlined_call_operand.vmem [shape: bf16[32,256], index: 6, kind: input, shape index: {}]   ;;  %s1892_s7 = inlined_call_operand.vmem [shape: f32[1,256], index: 7, kind: input, shape index: {}]   ;;  %s1893_s8 = inlined_call_operand.hbm [shape: f32[16,256], index: 8, kind: output, shape index: {}]  }
   0x1   :  { %15 = vsyncpa [#allocation3 + $0x1], 0  ;;  %s1534_s27 = smov 0   ;;  %s1536_s28 = smov 0  }
   0x2   :  { %s1538_s29 = smov 0   ;;  %s1540_s30 = smov 0  }
   0x3 LB: > { %s1555_s9 = sadd.s32 4294967295, %s1479_s30   ;;  %s1115_s10 = sadd.s32 4294967294, %s1479_s30   ;;  %s1479_s30 = sphi %s1540_s30, %s1899_s30   ;;  %s1475_s29 = sphi %s1538_s29, %s1898_s29   ;;  %s1471_s28 = sphi %s1536_s28, %s1897_s28   ;;  %s1467_s27 = sphi %s1534_s27, %s1896_s27  }
   0x4   : > { %s1559_s11 = sadd.s32 1, %s1479_s30   ;;  %s201_s12 = sadd.s32 1, %s1475_s29 }
   0x5   : > { %s198_s13 = ssub.s32 %s1479_s30, %s1559_s11  ;;  %p211_p0 = scmp.ne.s32.totalorder %s1475_s29, %s1471_s28 }
   0x6   : > { %p199_p1 = scmp.eq.s32.totalorder %s198_s13, 0  ;;  %p212_p2 = scmp.eq.s32.totalorder %s1555_s9, 1 }
   0x7   : > { %p217_p3 = scmp.ne.s32.totalorder %s1471_s28, %s1467_s27  ;;  %p218_p4 = scmp.eq.s32.totalorder %s1115_s10, 1 }
   0x8   : > { %s1570_s14 = scalar_select %p199_p1, %s1475_s29, %s201_s12  }
   0x9   : > { %p1572_p5 = por %p212_p2, %p211_p0  ;;  %p1576_p6 = por %p218_p4, %p217_p3 }
   0xa   : > { %p1118_p7 = scmp.ge.s32.totalorder %s1479_s30, 1  ;;  %p264_p8 = scmp.lt.s32.totalorder %s1479_s30, 3 }
   0xc   : > { %p265_p9 = pnand %p1118_p7, %p264_p8 }
   0xd   : > { %p297_p10 = scmp.lt.s32.totalorder (!%p265_p9), %s1555_s9, 1  ;;  %s294_s21 = sand.u32 (!%p265_p9), 1, %s1471_s28  }
   0xe   : > { %268 = sbr.rel (%p265_p9) target bundleno = 1448 (0x5a8), region = 52  ;;  %s1119_s22 = sshll.u32 (!%p265_p9), %s294_s21, 4 }
   0xf   : > { %s1188_s25 = sshll.u32 (!%p265_p9), %s1555_s9, 8  ;;  %s296_s26 = scalar_lea.vmem (!%p265_p9), [#allocation2], %s1119_s22 }
  0x10   : > { %s1056_s10 = sshll.u32 (!%p265_p9), %s296_s26, 4  ;;  %s1844_s17 = scalar_lea.hbm (!%p265_p9), %s1893_s8, %s1188_s25  ;;  %s1846_s10 = int_to_ptr.vmem [resolvable:$true] %s1056_s10 }
  0x11   : > { %s1419_s18 = scalar_lea.vmem (!%p265_p9), %s1846_s10, 256 }
  0x12   : > { %p1420_p11 = scmp.ne.s32.totalorder (!%p265_p9), %s1846_s10, %s1419_s18 }
  0x13   : > { %v1586_v0 = vld [vmem:[%s1886_s1 + $0x78] sm:$0xff]   ;;  %v1481_v1 = vmov 1   ;;  %s298_s19 = scalar_select %p297_p10, %s1555_s9, 1  ;;  %v1599_v3 = vld [vmem:[%s1886_s1 + $0x70] sm:$0xff]   ;;  %v1615_v5 = vld [vmem:[%s1886_s1 + $0x68] sm:$0xff]   ;;  %v1482_v9 = vmov 0   ;;  %v335_v21 = vlaneseq }
  0x14   : > { %1378 = vset.pattern.permute.xlu0 %v1481_v1  ;;  %1211 = vmatprep.subr.bf16.mxu1 %v1586_v0  ;;  %v1593_v2 = vld [vmem:[%s1886_s1 + $0x38] sm:$0xff]   ;;  %v1605_v4 = vld [vmem:[%s1886_s1 + $0x30] sm:$0xff]   ;;  %v1625_v7 = vld [vmem:[%s1886_s1 + $0x28] sm:$0xff]   ;;  %v1483_v12 = vmov 2   ;;  %v1484_v20 = vmov 0.0   ;;  %vm1486_vm8 = vmmov 0   ;;  %p1421_p12 = pnand %p1420_p11, %p1572_p5 }
  0x15   : > { %1189 = vmatprep.subr.bf16.mxu0 %v1586_v0  ;;  %s1120_s24 = sshll.u32 %s298_s19, 3  ;;  %1212 = vmatpush3.bf16.msra.mxu1 %v1593_v2  ;;  %v1632_v8 = vld [vmem:[%s1886_s1 + $0x60] sm:$0xff]   ;;  %v1648_v11 = vld [vmem:[%s1886_s1 + $0x58] sm:$0xff]   ;;  %v1663_v14 = vld [vmem:[%s1886_s1 + $0x50] sm:$0xff]   ;;  %v1708_v22 = vand.u32 127, %v335_v21  ;;  %v1487_v31 = vmov 3  }
  0x16   : > { %1190 = vmatpush3.bf16.msra.mxu0 %v1593_v2  ;;  %s300_s13 = scalar_lea.vmem %s1885_s0, %s1120_s24  ;;  %1213 = vmatprep.subr.bf16.mxu1 %v1599_v3  ;;  %v1641_v10 = vld [vmem:[%s1886_s1 + $0x20] sm:$0xff]   ;;  %v1656_v13 = vld [vmem:[%s1886_s1 + $0x18] sm:$0xff]   ;;  %v1669_v15 = vld [vmem:[%s1886_s1 + $0x10] sm:$0xff]   ;;  %v1485_v25 = vmov 1.0|1.0   ;;  %vm558_vm10 = vcmask 261120   ;;  %p1422_p13 = pneg %p1421_p12 }
  0x17   : > { %1191 = vmatprep.subr.bf16.mxu0 %v1599_v3  ;;  %v1618_v6 = vld [vmem:[%s300_s13] sm:$0xff]  ;;  %1380 = vset.pattern.permute.xlu1 %v1483_v12  ;;  %v1674_v16 = vld [vmem:[%s1886_s1 + $0x48] sm:$0xff]   ;;  %v1711_v23 = vadd.s32 128, %v1708_v22  ;;  %v1399_v27 = vld [vmem:[%s1887_s2 + $0x18] sm:$0xff]   ;;  %s1042_s9 = scalar_lea.sflag [#allocation3], %s294_s21  ;;  %s1488_s19 = smov [#allocation2]  }
  0x18   : > { %491 = vperm.xlu0 %1378, %v1618_v6   ;;  %658 = vperm.xlu1 %1380, %v1618_v6   ;;  %v1683_v17 = vld [vmem:[%s1886_s1 + $0x8] sm:$0xff]   ;;  %v1691_v18 = vld [vmem:[%s1886_s1 + $0x40] sm:$0xff]   ;;  %v1400_v28 = vld [vmem:[%s1887_s2 + $0x10] sm:$0xff]   ;;  %s1423_s20 = sshll.u32 %s1488_s19, 4  ;;  %s1424_s20 = int_to_ptr.vmem [resolvable:$false] %s1423_s20 }
  0x19   : > { %1214 = vmatpush3.bf16.msra.mxu1 %v1605_v4  ;;  %v1698_v19 = vld [vmem:[%s1886_s1] sm:$0xff]   ;;  %v1401_v29 = vld [vmem:[%s1887_s2 + $0x8] sm:$0xff]   ;;  %v1405_v63 = vld [vmem:[%s1887_s2 + $0x38] sm:$0xff]   ;;  %s1425_s22 = scalar_lea.vmem %s1424_s20, 512  ;;  %p1426_p0 = scmp.lt.s32.totalorder %s1846_s10, %s1424_s20 }
  0x1a   : > { %1192 = vmatpush3.bf16.msra.mxu0 %v1605_v4  ;;  %1215 = vmatprep.subr.bf16.mxu1 %v1615_v5  ;;  %v1402_v30 = vld [vmem:[%s1887_s2] sm:$0xff]   ;;  %v1403_v45 = vld [vmem:[%s1887_s2 + $0x28] sm:$0xff]   ;;  %p1427_p1 = scmp.lt.s32.totalorder %s1425_s22, %s1419_s18 }
  0x1b   : > { %1193 = vmatprep.subr.bf16.mxu0 %v1615_v5  ;;  %v1404_v46 = vld [vmem:[%s1887_s2 + $0x20] sm:$0xff]   ;;  %v1407_v12 = vld [vmem:[%s1889_s4 + $0x8] sm:$0xff]  }
  0x1c   : > { %1379 = vset.pattern.permute.xlu0 %v1482_v9  ;;  %1381 = vset.pattern.permute.xlu1 %v1487_v31  ;;  %p1428_p2 = por %p1427_p1, %p1426_p0 }
  0x1d   : > { %339 = vperm.xlu0 %1379, %v1618_v6   ;;  %1216 = vmatpush3.bf16.msra.mxu1 %v1625_v7 }
  0x1e   : > { %1217 = vmatprep.subr.bf16.mxu1 %v1632_v8  ;;  %1194 = vmatpush3.bf16.msra.mxu0 %v1625_v7  ;;  %p1429_p3 = pnand %p1428_p2, %p1422_p13 }
  0x1f   : > { %1195 = vmatprep.subr.bf16.mxu0 %v1632_v8  ;;  %770 = vperm.xlu1 %1381, %v1618_v6  }
  0x21   : > { %1218 = vmatpush3.bf16.msra.mxu1 %v1641_v10  ;;  %1382 = vset.pattern.permute.xlu0 %v1487_v31 }
  0x22   : > { %1219 = vmatprep.subr.bf16.mxu1 %v1648_v11  ;;  %1196 = vmatpush3.bf16.msra.mxu0 %v1641_v10 }
  0x23   : > { %1197 = vmatprep.subr.bf16.mxu0 %v1648_v11 }
  0x25   : > { %1220 = vmatpush3.bf16.msra.mxu1 %v1656_v13 }
  0x26   : > { %1221 = vmatprep.subr.bf16.mxu1 %v1663_v14  ;;  %1198 = vmatpush3.bf16.msra.mxu0 %v1656_v13 }
  0x27   : > { %1199 = vmatprep.subr.bf16.mxu0 %v1663_v14 }
  0x29   : > { %1222 = vmatpush3.bf16.msra.mxu1 %v1669_v15 }
  0x2a   : > { %1223 = vmatprep.subr.bf16.mxu1 %v1674_v16  ;;  %1200 = vmatpush3.bf16.msra.mxu0 %v1669_v15 }
  0x2b   : > { %1201 = vmatprep.subr.bf16.mxu0 %v1674_v16 }
  0x2d   : > { %1224 = vmatpush3.bf16.msra.mxu1 %v1683_v17 }
  0x2e   : > { %1225 = vmatprep.subr.bf16.mxu1 %v1691_v18  ;;  %1202 = vmatpush3.bf16.msra.mxu0 %v1683_v17 }
  0x2f   : > { %1203 = vmatprep.subr.bf16.mxu0 %v1691_v18 }
  0x31   : > { %1226 = vmatpush3.bf16.msra.mxu1 %v1698_v19 }
  0x32   : > { %1204 = vmatpush3.bf16.msra.mxu0 %v1698_v19  ;;  %1300 = vmatprep.subr.bf16.mxu1 %v1484_v20 }
  0x33   : > { %1292 = vmatprep.subr.bf16.mxu0 %v1484_v20 }
  0x93   : > { %v492_v24 = vpop.permute.xlu0 %491  ;;  %v659_v32 = vpop.permute.xlu1 %658 }
  0x94   : > { %vm493_vm0 = vcmp.eq.s32.totalorder %v492_v24, %v1708_v22  ;;  %vm494_vm1 = vcmp.eq.s32.totalorder %v492_v24, %v1711_v23  ;;  %vm661_vm9 = vcmp.eq.s32.totalorder %v659_v32, %v1711_v23  ;;  %vm660_vm12 = vcmp.eq.s32.totalorder %v659_v32, %v1708_v22 }
  0x95   : > { %vm1147_vm2 = vmpackc.low %vm493_vm0, %vm493_vm0 }
  0x96   : > { %vm1145_vm3 = vmpackc.low %vm494_vm1, %vm494_vm1 }
  0x97   : > { %1146 = vmatprep.mubr.msk.bf16.mxu1 %vm1145_vm3, %v1485_v25  ;;  %vm1157_vm11 = vmpackc.low %vm661_vm9, %vm661_vm9 }
  0x98   : > { %1148 = vmatmul.mubr.msk.bf16.vlgmr.msra.gmra.mxu1 %vm1147_vm2, %v1485_v25  ;;  %v340_v26 = vpop.permute.xlu0 %339  ;;  %vm1159_vm13 = vmpackc.low %vm660_vm12, %vm660_vm12 }
  0x99   : > { %vm341_vm4 = vcmp.eq.s32.totalorder %v340_v26, %v1708_v22  ;;  %vm342_vm5 = vcmp.eq.s32.totalorder %v340_v26, %v1711_v23  ;;  %1301 = vmatpush3.bf16.msra.mxu1 %v1401_v29  ;;  %1304 = vmatprep.mubr.msk.bf16.mxu1 %vm1486_vm8, %v1484_v20  ;;  %v1414_v26 = vld [vmem:[%s1891_s6 + $0x4] ss:$8 sps:$4 sm:$0xff]  }
  0x9a   : > { %vm1141_vm6 = vmpackc.low %vm341_vm4, %vm341_vm4  ;;  %1302 = vmatprep.subr.bf16.mxu1 %v1484_v20  ;;  %v771_v56 = vpop.permute.xlu1 %770 }
  0x9b   : > { %vm1139_vm7 = vmpackc.low %vm342_vm5, %vm342_vm5  ;;  %vm773_vm14 = vcmp.eq.s32.totalorder %v771_v56, %v1711_v23  ;;  %vm772_vm0 = vcmp.eq.s32.totalorder %v771_v56, %v1708_v22 }
  0x9c   : > { %1140 = vmatprep.mubr.msk.bf16.mxu0 %vm1139_vm7, %v1485_v25  ;;  %vm1166_vm15 = vmpackc.low %vm773_vm14, %vm773_vm14 }
  0x9d   : > { %1142 = vmatmul.mubr.msk.bf16.vlgmr.msra.gmra.mxu0 %vm1141_vm6, %v1485_v25  ;;  %1303 = vmatpush3.bf16.msra.mxu1 %v1402_v30  ;;  %vm1168_vm1 = vmpackc.low %vm772_vm0, %vm772_vm0 }
  0x9e   : > { %1293 = vmatpush3.bf16.msra.mxu0 %v1399_v27  ;;  %1296 = vmatprep.mubr.msk.bf16.mxu0 %vm1486_vm8, %v1484_v20  ;;  %v1412_v27 = vld [vmem:[%s1891_s6] ss:$8 sps:$4 sm:$0xff]  }
  0x9f   : > { %1294 = vmatprep.subr.bf16.mxu0 %v1484_v20  ;;  %1308 = vmatprep.subr.bf16.mxu1 %v1484_v20 }
  0xa2   : > { %1295 = vmatpush3.bf16.msra.mxu0 %v1400_v28  ;;  %v1174_v28 = vld [vmem:[%s1890_s5] ss:$0 sm:$0xff] }
  0xa3   : > { %1239 = vmatprep.subr.bf16.mxu0 %v1586_v0 }
 0x158   : > { %v1227_v33 = vpop.f32.mrf.mxu1 }
 0x15a   : > { %v1228_v34 = vpop.f32.mrf.mxu1 }
 0x15b   : > { %v1229_v35 = vadd.f32 %v1228_v34, %v1227_v33 }
 0x15c   : > { %v1230_v36 = vpop.f32.mrf.mxu1 }
 0x15d   : > { %v545_v37 = vpack.c.bf16 %v1229_v35, %v1229_v35  ;;  %v1205_v38 = vpop.f32.mrf.mxu0  ;;  %v966_v36 = vshrl.u32 %v335_v21, 7 }
 0x15e   : > { %v1231_v39 = vpop.f32.mrf.mxu1 }
 0x15f   : > { %v1206_v40 = vpop.f32.mrf.mxu0  ;;  %1297 = vmatmul.mubr.msk.bf16.vlgmr.msra.gmra.mxu0 %vm558_vm10, %v545_v37  ;;  %v967_v37 = vsub.s32 0, %v966_v36  ;;  %v971_v39 = vsub.s32 1, %v966_v36 }
 0x160   : > { %v1207_v41 = vadd.f32 %v1206_v40, %v1205_v38  ;;  %1240 = vmatpush3.bf16.msra.mxu0 %v1593_v2  ;;  %1158 = vmatprep.mubr.msk.bf16.mxu0 %vm1157_vm11, %v1485_v25  ;;  %v963_v38 = vld [vmem:[%s1892_s7] sm:$0x3] }
 0x161   : > { %1241 = vmatprep.subr.bf16.mxu0 %v1599_v3  ;;  %v1208_v42 = vpop.f32.mrf.mxu0  ;;  %v968_v40 = vrot.slane %v963_v38, %v967_v37 }
 0x162   : > { %v489_v43 = vpack.c.bf16 %v1207_v41, %v1207_v41  ;;  %v972_v41 = vrot.slane %v963_v38, %v971_v39 }
 0x163   : > { %v1209_v44 = vpop.f32.mrf.mxu0 }
 0x164   : > { %1242 = vmatpush3.bf16.msra.mxu0 %v1605_v4  ;;  %1305 = vmatmul.mubr.msk.bf16.vlgmr.msra.gmra.mxu1 %vm558_vm10, %v489_v43 }
 0x165   : > { %1243 = vmatprep.subr.bf16.mxu0 %v1615_v5  ;;  %1312 = vmatprep.mubr.msk.bf16.mxu1 %vm1486_vm8, %v1484_v20 }
 0x166   : > { %1309 = vmatpush3.bf16.msra.mxu1 %v1403_v45 }
 0x167   : > { %1310 = vmatprep.subr.bf16.mxu1 %v1484_v20 }
 0x168   : > { %1244 = vmatpush3.bf16.msra.mxu0 %v1625_v7 }
 0x169   : > { %1245 = vmatprep.subr.bf16.mxu0 %v1632_v8 }
 0x16a   : > { %1311 = vmatpush3.bf16.msra.mxu1 %v1404_v46 }
 0x16b   : > { %1264 = vmatprep.subr.bf16.mxu1 %v1586_v0  ;;  %v1406_v0 = vld [vmem:[%s1887_s2 + $0x30] sm:$0xff]  }
 0x16c   : > { %1246 = vmatpush3.bf16.msra.mxu0 %v1641_v10 }
 0x16d   : > { %1247 = vmatprep.subr.bf16.mxu0 %v1648_v11 }
 0x170   : > { %1248 = vmatpush3.bf16.msra.mxu0 %v1656_v13 }
 0x171   : > { %1249 = vmatprep.subr.bf16.mxu0 %v1663_v14 }
 0x174   : > { %1250 = vmatpush3.bf16.msra.mxu0 %v1669_v15 }
 0x175   : > { %1251 = vmatprep.subr.bf16.mxu0 %v1674_v16 }
 0x178   : > { %1252 = vmatpush3.bf16.msra.mxu0 %v1683_v17 }
 0x179   : > { %1253 = vmatprep.subr.bf16.mxu0 %v1691_v18 }
 0x17c   : > { %1254 = vmatpush3.bf16.msra.mxu0 %v1698_v19 }
 0x17d   : > { %1316 = vmatprep.subr.bf16.mxu0 %v1484_v20 }
 0x17f   : > { %1160 = vmatmul.mubr.msk.bf16.vlgmr.msra.gmra.mxu0 %vm1159_vm13, %v1485_v25 }
 0x180   : > { %1320 = vmatprep.mubr.msk.bf16.mxu0 %vm1486_vm8, %v1484_v20  ;;  %1317 = vmatpush3.bf16.msra.mxu0 %v1405_v63 }
 0x181   : > { %1318 = vmatprep.subr.bf16.mxu0 %v1484_v20 }
 0x184   : > { %1319 = vmatpush3.bf16.msra.mxu0 %v1406_v0 }
 0x185   : > { %1324 = vmatprep.subr.bf16.mxu0 %v1484_v20 }
 0x21f   : > { %v596_v47 = vpop.f32.mrf.mxu0 }
 0x221   : > { %v1298_v48 = vpop.f32.mrf.mxu0 }
 0x223   : > { %v599_v49 = vpop.f32.mrf.mxu0 }
 0x224   : > { %v651_v50 = vpop.f32.mrf.mxu1 }
 0x225   : > { %v652_v51 = vadd.f32 %v651_v50, %v596_v47  ;;  %v1299_v52 = vpop.f32.mrf.mxu0 }
 0x226   : > { %v1306_v53 = vpop.f32.mrf.mxu1 }
 0x228   : > { %v654_v54 = vpop.f32.mrf.mxu1 }
 0x22a   : > { %v1307_v55 = vpop.f32.mrf.mxu1 }
 0x23f   : > { %v1255_v57 = vpop.f32.mrf.mxu0 }
 0x241   : > { %v1256_v58 = vpop.f32.mrf.mxu0 }
 0x242   : > { %v1257_v59 = vadd.f32 %v1256_v58, %v1255_v57 }
 0x243   : > { %v1258_v60 = vpop.f32.mrf.mxu0 }
 0x244   : > { %v712_v61 = vpack.c.bf16 %v1257_v59, %v1257_v59 }
 0x245   : > { %v1259_v62 = vpop.f32.mrf.mxu0 }
 0x246   : > { %1313 = vmatmul.mubr.msk.bf16.vlgmr.msra.gmra.mxu1 %vm558_vm10, %v712_v61 }
 0x247   : > { %1265 = vmatpush3.bf16.msra.mxu1 %v1593_v2  ;;  %1167 = vmatprep.mubr.msk.bf16.mxu1 %vm1166_vm15, %v1485_v25 }
 0x248   : > { %1266 = vmatprep.subr.bf16.mxu1 %v1599_v3 }
 0x24b   : > { %1267 = vmatpush3.bf16.msra.mxu1 %v1605_v4 }
 0x24c   : > { %1268 = vmatprep.subr.bf16.mxu1 %v1615_v5 }
 0x24f   : > { %1269 = vmatpush3.bf16.msra.mxu1 %v1625_v7 }
 0x250   : > { %1270 = vmatprep.subr.bf16.mxu1 %v1632_v8 }
 0x253   : > { %1271 = vmatpush3.bf16.msra.mxu1 %v1641_v10 }
 0x254   : > { %1272 = vmatprep.subr.bf16.mxu1 %v1648_v11 }
 0x257   : > { %1273 = vmatpush3.bf16.msra.mxu1 %v1656_v13  ;;  %v1408_v13 = vld [vmem:[%s1889_s4] sm:$0xff]  }
 0x258   : > { %1274 = vmatprep.subr.bf16.mxu1 %v1663_v14 }
 0x25b   : > { %1275 = vmatpush3.bf16.msra.mxu1 %v1669_v15  ;;  %v1173_v15 = vld [vmem:[%s1888_s3] ss:$0 sm:$0xff] }
 0x25c   : > { %1276 = vmatprep.subr.bf16.mxu1 %v1674_v16 }
 0x25f   : > { %1277 = vmatpush3.bf16.msra.mxu1 %v1683_v17 }
 0x260   : > { %1278 = vmatprep.subr.bf16.mxu1 %v1691_v18 }
 0x263   : > { %1279 = vmatpush3.bf16.msra.mxu1 %v1698_v19 }
 0x266   : > { %1169 = vmatmul.mubr.msk.bf16.vlgmr.msra.gmra.mxu1 %vm1168_vm1, %v1485_v25  ;;  %v1409_v25 = vld [vmem:[%s1891_s6 + $0x10] ss:$8 sps:$4 sm:$0xff]  }
 0x267   : > { %1030 = vmatprep.mubr.bf16.mxu1 %v1482_v9 }
 0x306   : > { %v762_v1 = vpop.f32.mrf.mxu1 }
 0x307   : > { %v768_v2 = vadd.f32 %v762_v1, %v652_v51 }
 0x308   : > { %v1314_v3 = vpop.f32.mrf.mxu1 }
 0x30a   : > { %v765_v4 = vpop.f32.mrf.mxu1 }
 0x30c   : > { %v1315_v5 = vpop.f32.mrf.mxu1 }
 0x326   : > { %v1280_v6 = vpop.f32.mrf.mxu1 }
 0x328   : > { %v1281_v7 = vpop.f32.mrf.mxu1 }
 0x329   : > { %v1282_v8 = vadd.f32 %v1281_v7, %v1280_v6 }
 0x32a   : > { %v1283_v9 = vpop.f32.mrf.mxu1 }
 0x32b   : > { %v824_v10 = vpack.c.bf16 %v1282_v8, %v1282_v8 }
 0x32c   : > { %v1284_v11 = vpop.f32.mrf.mxu1 }
 0x32d   : > { %1321 = vmatmul.mubr.msk.bf16.vlgmr.msra.gmra.mxu0 %vm558_vm10, %v824_v10 }
 0x32e   : > { %1328 = vmatprep.mubr.msk.bf16.mxu0 %vm1486_vm8, %v1484_v20  ;;  %1325 = vmatpush3.bf16.msra.mxu0 %v1407_v12 }
 0x32f   : > { %1326 = vmatprep.subr.bf16.mxu0 %v1484_v20  ;;  %v1411_v20 = vld [vmem:[%s1891_s6 + $0x14] ss:$8 sps:$4 sm:$0xff]  }
 0x330   : > { %1010 = vmatprep.subr.bf16.mxu1 %v1411_v20 }
 0x331   : > { %1011 = vmatpush1.bf16.msra.mxu1 %v1409_v25 }
 0x332   : > { %1327 = vmatpush3.bf16.msra.mxu0 %v1408_v13  ;;  %1012 = vmatprep.subr.bf16.mxu1 %v1414_v26 }
 0x335   : > { %1013 = vmatpush1.bf16.msra.mxu1 %v1412_v27 }
 0x3ed   : > { %v874_v14 = vpop.f32.mrf.mxu0 }
 0x3ee   : > { %v880_v16 = vadd.f32 %v874_v14, %v768_v2 }
 0x3ef   : > { %v1322_v17 = vpop.f32.mrf.mxu0 }
 0x3f0   : > { %v888_v18 = vadd.f32 %v1173_v15, %v880_v16 }
 0x3f1   : > { %v877_v19 = vpop.f32.mrf.mxu0 }
 0x3f2   : > { %1415 = vtanh.f32 %v888_v18 }
 0x3f3   : > { %v1323_v22 = vpop.f32.mrf.mxu0 }
 0x3ff   : > { %v1416_v23 = vpop.eup %1415 }
 0x400   : > { %v890_v24 = vpack.c.bf16 %v1416_v23, %v1416_v23 }
 0x402   : > { %1329 = vmatmul.mubr.msk.bf16.vlgmr.msra.gmra.mxu0 %vm558_vm10, %v890_v24 }
 0x4c2   : > { %v951_v29 = vpop.f32.mrf.mxu0 }
 0x4c3   : > { %v952_v30 = vadd.f32 %v1174_v28, %v951_v29 }
 0x4c4   : > { %v1330_v31 = vpop.f32.mrf.mxu0 }
 0x4c5   : > { %1417 = vtanh.f32 %v952_v30 }
 0x4c6   : > { %v954_v32 = vpop.f32.mrf.mxu0 }
 0x4c8   : > { %v1331_v33 = vpop.f32.mrf.mxu0 }
 0x4d2   : > { %v1418_v34 = vpop.eup %1417 }
 0x4d3   : > { %v958_v35 = vpack.c.bf16 %v1418_v34, %v1418_v34 }
 0x4d5   : > { %1182 = vmatmul.mubr.msk.bf16.vlgmr.msra.gmra.mxu1 %vm558_vm10, %v958_v35 }
 0x595   : > { %v1032_v42 = vpop.f32.mrf.mxu1 }
 0x596   : > { %v1033_v43 = vadd.f32 %v1032_v42, %v968_v40 }
 0x597   : > { %v1034_v44 = vpop.f32.mrf.mxu1 }
 0x598   : > { %1039 = vst [vmem:[%s296_s26] sm:$0xff] %v1033_v43  ;;  %v1035_v45 = vadd.f32 %v1034_v44, %v972_v41 }
 0x599   : > { %v1036_v21 = vpop.f32.mrf.mxu1 }
 0x59a   : > { %1040 = vst [vmem:[%s296_s26 + $0x8] sm:$0xff] %v1035_v45 }
 0x59b   : > { %v1037_v46 = vpop.f32.mrf.mxu1 }
 0x59c   : > { %1432 = shalt.err (!%p1429_p3)
}
 0x59d   : > { %s1433_s23 = scalar_lea.hbm %s1844_s17, 256  ;;  %s1437_s25 = scalar_lea.hbm %s1893_s8, 512 }
 0x59e   : > { %p1434_p4 = scmp.ne.s32.totalorder %s1844_s17, %s1433_s23  ;;  %p1438_p9 = scmp.lt.s32.totalorder %s1844_s17, %s1893_s8 }
 0x59f   : > { %p1439_p10 = scmp.lt.s32.totalorder %s1437_s25, %s1433_s23 }
 0x5a0   : > { %p1435_p7 = pnand %p1434_p4, %p1572_p5 }
 0x5a1   : > { %p1440_p11 = por %p1439_p10, %p1438_p9 }
 0x5a2   : > { %p1436_p8 = pneg %p1435_p7 }
 0x5a4   : > { %p1441_p12 = pnand %p1440_p11, %p1436_p8 }
 0x5a6   : > { %1444 = shalt.err (!%p1441_p12)
}
 0x5a7   : > { %1332 = dma.vmem_to_hbm [thread:$0]  (%p1572_p5), %s1846_s10, 256, %s1844_s17, %s1042_s9  }
 0x5a8 PF: > { %p1338_p13 = scmp.ge.s32.totalorder %s1479_s30, 2  ;;  %s1068_s13 = sand.u32 1, %s1467_s27  }
 0x5a9   : > { %s1069_s18 = scalar_lea.sflag [#allocation3], %s1068_s13 }
 0x5aa   : > { %p1335_p0 = pnand %p1338_p13, %p1576_p6 }
 0x5ac   : > { %p1336_p1 = pneg %p1335_p0 }
 0x5ae   : > { %1462 = dma.done.wait (%p1336_p1), %s1069_s18, 256  }
 0x5af   : > { %1464 = vsyncadd (%p1336_p1), %s1069_s18, 4294967040  ;;  %p18_p2 = scmp.ge.s32.totalorder %s1559_s11, 4   ;;  %s1896_s27 = smov %s1471_s28 }
 0x5b0   : > { %s1897_s28 = smov %s1475_s29  ;;  %s1898_s29 = smov %s1570_s14 }
 0x5b1   : > { %s1899_s30 = smov %s1559_s11  ;;  %20 = sbr.rel (!%p18_p2) target bundleno = 3 (0x3), region = 87 }
 0x5b6   :  { %1074 = vsyncpa [#allocation3], 1 }
 0x5b7   :  { %1076 = vsyncpa [#allocation3 + $0x1], 1 }

</bundles_post_ra>
